<compile_context>
chip_gen: v5e
topology: v5e:2x2
jax: 0.10.0
libtpu: 0.0.40
codegen_flags: <defaults>
</compile_context>

<pallas_src>
import math
import functools

import jax
import jax.numpy as jnp
from jax.experimental import pallas as pl
from jax.experimental.pallas import tpu as pltpu


# -----------------------------------------------------------------------------
# Parameter setup (equivalent of the module's __init__): build the PE buffer.
# -----------------------------------------------------------------------------
def make_positional_encoding_table(d_model: int, max_length: int = 5000,
                                   dtype=jnp.float32):
    k = jnp.arange(max_length, dtype=jnp.float32)[:, None]                  # (L, 1)
    div_term = jnp.exp(
        jnp.arange(0, d_model, 2, dtype=jnp.float32)
        * (-math.log(10000.0) / d_model)
    )                                                                        # (ceil(D/2),)
    ang = k * div_term                                                       # (L, ceil(D/2))
    pe = jnp.zeros((max_length, d_model), jnp.float32)
    pe = pe.at[:, 0::2].set(jnp.sin(ang))
    # Slice the cos half so odd d_model also works (fixes ref-module corner case).
    pe = pe.at[:, 1::2].set(jnp.cos(ang)[:, : d_model // 2])
    return pe.astype(dtype)                                                  # (L, D)


# -----------------------------------------------------------------------------
# Kernels: operate on lane-dense 2D tiles.
#   x_ref   : (TR, TC)   tile of the flattened (B, S*D) input
#   pe_ref  : (1,  TC)   matching tile of the flattened PE row (broadcast over TR)
#   bits_ref: (TR, TC)   uint32 random bits (training only)
# -----------------------------------------------------------------------------
def _pe_add_kernel(x_ref, pe_ref, o_ref):
    o_ref[...] = x_ref[...] + pe_ref[...]


def _pe_add_dropout_kernel(x_ref, pe_ref, bits_ref, o_ref, *, threshold, scale):
    y = x_ref[...] + pe_ref[...]
    keep = bits_ref[...] >= jnp.uint32(threshold)          # P(drop) = threshold / 2^32
    o_ref[...] = jnp.where(keep, y * jnp.asarray(scale, y.dtype),
                           jnp.zeros((), y.dtype))


# -----------------------------------------------------------------------------
# Tile selection: lane-dense columns (multiple of 128 when S*D allows it),
# ~2 MiB per buffer so double-buffered in/out/bits comfortably fit v7x VMEM.
# -----------------------------------------------------------------------------
def _pick_tiles(B, N, itemsize, target_bytes=2 * 1024 * 1024):
    TR = 8 if (B >= 8 and B % 8 == 0) else B               # rows: 8-sublane aligned or full
    if N % 128 != 0:
        return TR, N                                        # full-dim block (still legal)
    tc = max(128, (target_bytes // max(1, TR * itemsize)) // 128 * 128)
    tc = min(tc, N)
    while N % tc != 0:                                      # keep the grid exact
        tc -= 128
    return TR, tc


# -----------------------------------------------------------------------------
# Forward wrapper: out = dropout(x + pe[:S]), x is (B, S, D) batch-first.
# -----------------------------------------------------------------------------
def positional_encoding_forward(x, pe_table, *, p=0.1, training=False, rng_key=None):
    B, S, D = x.shape
    N = S * D

    use_dropout = bool(training) and float(p) > 0.0
    if use_dropout and float(p) >= 1.0:
        return jnp.zeros_like(x)                            # nn.Dropout(p=1) -> all zeros

    x2 = x.reshape(B, N)                                     # contiguous reshape, no copy
    pe2 = pe_table[:S, :].astype(x.dtype).reshape(1, N)

    TR, TC = _pick_tiles(B, N, jnp.dtype(x.dtype).itemsize)
    grid = (B // TR, N // TC)

    x_spec = pl.BlockSpec((TR, TC), lambda i, j: (i, j))
    pe_spec = pl.BlockSpec((1, TC), lambda i, j: (0, j))     # broadcast over batch rows
    out_spec = pl.BlockSpec((TR, TC), lambda i, j: (i, j))

    if use_dropout:
        if rng_key is None:
            rng_key = jax.random.PRNGKey(0)
        bits = jax.random.bits(rng_key, (B, N), dtype=jnp.uint32)
        # Clamp so p close to 1.0 cannot wrap the uint32 threshold.
        threshold = min(int(round(float(p) * (2.0 ** 32))), 2 ** 32 - 1)
        scale = 1.0 / (1.0 - float(p))
        kernel = functools.partial(_pe_add_dropout_kernel,
                                   threshold=threshold, scale=scale)
        in_specs = [x_spec, pe_spec, x_spec]
        args = (x2, pe2, bits)
    else:
        kernel = _pe_add_kernel
        in_specs = [x_spec, pe_spec]
        args = (x2, pe2)

    out2 = pl.pallas_call(
        kernel,
        out_shape=jax.ShapeDtypeStruct((B, N), x.dtype),
        grid=grid,
        in_specs=in_specs,
        out_specs=out_spec,
        compiler_params=pltpu.CompilerParams(
            dimension_semantics=("parallel", "parallel"),    # both axes independent
        ),
    )(*args)

    return out2.reshape(B, S, D)


if __name__ == "__main__":
    # Small shapes consistent with the module's forward: (batch, seq, d_model)
    batch, seq, d_model = 2, 8, 32
    max_length = 64
    p_drop = 0.1

    key = jax.random.PRNGKey(0)
    x_key, drop_key = jax.random.split(key)
    x = jax.random.normal(x_key, (batch, seq, d_model), dtype=jnp.float32)

    pe_table = make_positional_encoding_table(d_model, max_length)

    # Eval mode (dropout = identity): deterministic, check against reference.
    out_eval = positional_encoding_forward(x, pe_table, p=p_drop, training=False)
    out_eval = jax.block_until_ready(out_eval)
    ref = x + pe_table[None, :seq, :]
    assert out_eval.shape == (batch, seq, d_model)
    assert jnp.allclose(out_eval, ref, atol=1e-6, rtol=1e-6), "eval-mode mismatch"

    # Training mode: exercises the in-kernel dropout select path.
    out_train = positional_encoding_forward(
        x, pe_table, p=p_drop, training=True, rng_key=drop_key)
    out_train = jax.block_until_ready(out_train)
    assert out_train.shape == (batch, seq, d_model)
    # Sanity: surviving elements are (x+pe)/(1-p) or exactly zero.
    scaled_ref = ref / (1.0 - p_drop)
    is_zero = jnp.isclose(out_train, 0.0, atol=1e-6)
    is_scaled = jnp.isclose(out_train, scaled_ref, atol=1e-5, rtol=1e-5)
    assert bool(jnp.all(is_zero | is_scaled)), "dropout-mode values inconsistent"

    print("KERNEL_OK")
</pallas_src>

<mosaic_0001>
module attributes {stable_mosaic.version = 11 : i64} {
  func.func @_pe_add_kernel(%arg0: i32, %arg1: i32, %arg2: memref<2x256xf32, #tpu.memory_space<vmem>>, %arg3: memref<1x256xf32, #tpu.memory_space<vmem>>, %arg4: memref<2x256xf32, #tpu.memory_space<vmem>>) attributes {dimension_semantics = [#tpu.dimension_semantics<parallel>, #tpu.dimension_semantics<parallel>], iteration_bounds = array<i64: 1, 1>, scalar_prefetch = 0 : i64, scratch_operands = 0 : i64, tpu.core_type = #tpu.core_type<tc>, window_params = [{transform_indices = @transform_0, window_bounds = array<i64: 2, 256>}, {transform_indices = @transform_1, window_bounds = array<i64: 1, 256>}, {transform_indices = @transform_2, window_bounds = array<i64: 2, 256>}]} {
    %c0 = arith.constant 0 : index
    %c0_0 = arith.constant 0 : index
    %0 = vector.load %arg2[%c0, %c0_0] : memref<2x256xf32, #tpu.memory_space<vmem>>, vector<2x256xf32>
    %c0_1 = arith.constant 0 : index
    %c0_2 = arith.constant 0 : index
    %1 = vector.load %arg3[%c0_1, %c0_2] : memref<1x256xf32, #tpu.memory_space<vmem>>, vector<1x256xf32>
    %2 = vector.broadcast %1 : vector<1x256xf32> to vector<2x256xf32>
    %3 = arith.addf %0, %2 : vector<2x256xf32>
    %c0_3 = arith.constant 0 : index
    %c0_4 = arith.constant 0 : index
    %4 = vector.load %arg4[%c0_3, %c0_4] : memref<2x256xf32, #tpu.memory_space<vmem>>, vector<2x256xf32>
    tpu.vector_store %arg4[%c0_3, %c0_4], %3 {strides = array<i32>} : memref<2x256xf32, #tpu.memory_space<vmem>>, vector<2x256xf32>,
    return
  }
  func.func @transform_0(%arg0: i32, %arg1: i32) -> (i32, i32) {
    %c0_i32 = arith.constant 0 : i32
    return %arg0, %arg1 : i32, i32
  }
  func.func @transform_1(%arg0: i32, %arg1: i32) -> (i32, i32) {
    %c0_i32 = arith.constant 0 : i32
    %c0_i32_0 = arith.constant 0 : i32
    return %c0_i32, %arg1 : i32, i32
  }
  func.func @transform_2(%arg0: i32, %arg1: i32) -> (i32, i32) {
    %c0_i32 = arith.constant 0 : i32
    return %arg0, %arg1 : i32, i32
  }
}

</mosaic_0001>

<bundles_post_ra>
// kernel: tpu_custom_call.1
= control target key start
LH: loop header
LB: loop body
LE: loop exit
PB: predicated region body
PF: predicated region fallthrough
CT: control target
= control target key end

     0   :  { %7 = vsyncpa [#allocation3], 0  ;;  %s177_s0 = inlined_call_operand.hbm [shape: f32[2,256], index: 0, kind: input, shape index: {}]   ;;  %s178_s1 = inlined_call_operand.hbm [shape: f32[1,256], index: 1, kind: input, shape index: {}]   ;;  %s179_s2 = inlined_call_operand.hbm [shape: f32[2,256], index: 2, kind: output, shape index: {}]  }
   0x1   :  { %8 = vsyncpa [#allocation6], 0 }
   0x2   :  { %9 = vsyncpa [#allocation4], 0  ;;  %s15_s11 = sshll.u32 %s177_s0, 4  ;;  %s150_s12 = smov [#allocation2]   ;;  %s16_s11 = int_to_ptr.hbm [resolvable:$true] %s15_s11 }
   0x3   :  { %s17_s13 = sshll.u32 %s150_s12, 4  ;;  %s26_s16 = sshll.u32 %s178_s1, 4  ;;  %s18_s13 = int_to_ptr.vmem [resolvable:$true] %s17_s13  ;;  %s27_s16 = int_to_ptr.hbm [resolvable:$true] %s26_s16 }
   0x4   :  { %20 = dma.hbm_to_vmem [thread:$0]  %s16_s11, 64, %s18_s13, [#allocation3]  }
   0x5   :  { %s151_s17 = smov [#allocation5]  }
   0x6   :  { %s28_s18 = sshll.u32 %s151_s17, 4  ;;  %s29_s18 = int_to_ptr.vmem [resolvable:$true] %s28_s18 }
   0x7   :  { %31 = dma.hbm_to_vmem [thread:$0]  %s27_s16, 32, %s29_s18, [#allocation6]  }
   0x8   :  { %144 = dma.done.wait [#allocation3], 64  }
   0x9   :  { %145 = vsyncadd [#allocation3], 4294967232 }
   0xa   :  { %146 = dma.done.wait [#allocation6], 32  }
   0xb   :  { %147 = vsyncadd [#allocation6], 4294967264  ;;  %v41_v0 = vld [vmem:[#allocation5] sm:$0x3]  ;;  %vm46_vm0 = vcmask 1041408   ;;  %s152_s0 = smov [#allocation7]  }
   0xc   :  { %v43_v1 = vperm.slane %v41_v0, 0  ;;  %v44_v2 = vperm.slane %v41_v0, 1  ;;  %v40_v3 = vld [vmem:[#allocation2] sm:$0xf]  ;;  %s56_s19 = sshll.u32 %s152_s0, 4  ;;  %s58_s21 = sshll.u32 %s179_s2, 4  ;;  %s57_s19 = int_to_ptr.vmem [resolvable:$true] %s56_s19  ;;  %s59_s21 = int_to_ptr.hbm [resolvable:$true] %s58_s21 }
   0xe   :  { %v45_v4 = vrot.slane %v44_v2, 6 }
  0x10   :  { %v47_v5 = vsel %vm46_vm0, %v43_v1, %v45_v4 }
  0x11   :  { %v49_v6 = vadd.f32 %v47_v5, %v40_v3 }
  0x13   :  { %50 = vst [vmem:[#allocation7] sm:$0xf] %v49_v6 }
  0x14   :  { %61 = dma.vmem_to_hbm [thread:$0]  %s57_s19, 64, %s59_s21, [#allocation4]  }
  0x15   :  { %148 = dma.done.wait [#allocation4], 64  }
  0x16   :  { %149 = vsyncadd [#allocation4], 4294967232 }
  0x17   :  { %66 = vsyncpa [#allocation3], 1 }
  0x18   :  { %67 = vsyncpa [#allocation6], 1 }
  0x19   :  { %68 = vsyncpa [#allocation4], 1 }

</bundles_post_ra>
